<compile_context>
chip_gen: v7x
topology: tpu7x:2x2x1
jax: 0.10.0
libtpu: 0.0.40
codegen_flags: <defaults>
</compile_context>

<pallas_src>
import jax
import jax.numpy as jnp
from jax.experimental import pallas as pl
from jax.experimental.pallas import tpu as pltpu


def _pooler_kernel(x_ref, w_ref, b_ref, o_ref):
    # x_ref: [tm, Hin_p]   first-token activations (K fully resident, padded)
    # w_ref: [tn, Hin_p]   torch-layout [out, in] weight tile (no transpose)
    # b_ref: [1, tn]       bias tile
    # o_ref: [tm, tn]      pooled output tile
    y = jax.lax.dot_general(
        x_ref[...], w_ref[...],
        dimension_numbers=(((1,), (1,)), ((), ())),  # contract Hin vs Hin
        preferred_element_type=jnp.float32)
    y = y + b_ref[...].astype(jnp.float32)
    o_ref[...] = jnp.tanh(y).astype(o_ref.dtype)


def _round_up(x, m):
    return ((x + m - 1) // m) * m


def bert_pooler(hidden_states, weight, bias):
    """BertPooler forward.

    hidden_states: [B, S, H]
    weight:        [H, H] torch nn.Linear layout ([out, in]); consumed
                   directly -- no transpose is materialized.
    bias:          [H]
    returns:       [B, H] = tanh(hidden_states[:, 0] @ weight.T + bias)
    """
    B, S, H = hidden_states.shape
    Hout, Hin = weight.shape
    assert Hin == H and Hout == H and bias.shape == (H,)
    out_dtype = hidden_states.dtype

    # Lane-dense padded extents (multiples of 128).
    hin_p = _round_up(Hin, 128)
    hout_p = _round_up(Hout, 128)

    # 2 j-steps when the half stays 128-aligned (H=768 -> 384, H=1024 -> 512),
    # otherwise one full-width tile (small / odd H).
    tn = hout_p // 2 if (hout_p // 2) % 128 == 0 else hout_p
    # Whole batch in one tile when it fits a single MXU pass, else 128 rows.
    tm = B if B <= 128 else 128

    n_i = pl.cdiv(B, tm)
    n_j = hout_p // tn

    # Fused first-token slice: view [B, S, H] as [B, S*H]; the first hin_p
    # columns of each row cover token 0 (plus, when H % 128 != 0, a spill
    # into token 1 that the zero-padded weight columns annihilate).
    # TODO(synk): for odd H with non-finite padding/token-1 activations,
    # 0 * Inf would poison the accumulation -- real BERT sizes are unaffected.
    x_flat = hidden_states.reshape(B, S * H)
    if S * H < hin_p:
        x_flat = jnp.pad(x_flat, ((0, 0), (0, hin_p - S * H)))

    w = weight
    if (hout_p, hin_p) != (Hout, Hin):
        # Only hit when H is not 128-aligned (never for real BERT configs).
        w = jnp.pad(weight, ((0, hout_p - Hout), (0, hin_p - Hin)))
    b2 = bias.reshape(1, Hout)
    if hout_p != Hout:
        b2 = jnp.pad(b2, ((0, 0), (0, hout_p - Hout)))

    x_item = jnp.dtype(x_flat.dtype).itemsize
    w_item = jnp.dtype(w.dtype).itemsize
    cost = pl.CostEstimate(
        flops=2 * B * hin_p * hout_p,
        transcendentals=B * hout_p,
        # Weight streamed exactly once (j outermost); x re-fetched per j-step.
        bytes_accessed=(hin_p * hout_p * w_item          # weight, once
                        + n_j * B * hin_p * x_item       # x, once per j-step
                        + hout_p * w_item                # bias
                        + B * hout_p * x_item),          # output
    )

    out = pl.pallas_call(
        _pooler_kernel,
        out_shape=jax.ShapeDtypeStruct((B, hout_p), out_dtype),
        grid_spec=pltpu.PrefetchScalarGridSpec(
            num_scalar_prefetch=0,
            # j (weight half) outermost, batch innermost: weight block index
            # is constant across batch tiles -> the dominant HxH weight is
            # DMA'd from HBM exactly once even when B > 128.
            grid=(n_j, n_i),
            in_specs=[
                pl.BlockSpec((tm, hin_p), lambda j, i: (i, 0)),   # x
                pl.BlockSpec((tn, hin_p), lambda j, i: (j, 0)),   # weight
                pl.BlockSpec((1, tn), lambda j, i: (0, j)),       # bias
            ],
            out_specs=pl.BlockSpec((tm, tn), lambda j, i: (i, j)),
        ),
        compiler_params=pltpu.CompilerParams(
            dimension_semantics=("parallel", "parallel")),
        cost_estimate=cost,
    )(x_flat, w, b2)

    return out[:, :Hout] if hout_p != Hout else out


if __name__ == "__main__":
    B, S, H = 2, 8, 32  # small config: batch=2, seq=8, hidden=32

    key = jax.random.PRNGKey(0)
    k_x, k_w, k_b = jax.random.split(key, 3)

    hidden_states = jax.random.normal(k_x, (B, S, H), dtype=jnp.float32)
    # nn.Linear params in torch layout: weight [out, in], bias [out].
    weight = jax.random.normal(k_w, (H, H), dtype=jnp.float32) * 0.02
    bias = jax.random.normal(k_b, (H,), dtype=jnp.float32) * 0.02

    out = jax.jit(bert_pooler)(hidden_states, weight, bias)
    jax.block_until_ready(out)

    # Reference check (pure JAX) to validate semantics.
    ref = jnp.tanh(hidden_states[:, 0, :] @ weight.T + bias)
    assert out.shape == (B, H)
    assert jnp.allclose(out, ref, atol=1e-5, rtol=1e-5), float(
        jnp.max(jnp.abs(out - ref)))

    print("KERNEL_OK")
</pallas_src>

<mosaic_0001>
module attributes {stable_mosaic.version = 11 : i64} {
  func.func @_pooler_kernel(%arg0: i32, %arg1: i32, %arg2: memref<2x128xf32, #tpu.memory_space<vmem>>, %arg3: memref<128x128xf32, #tpu.memory_space<vmem>>, %arg4: memref<1x128xf32, #tpu.memory_space<vmem>>, %arg5: memref<2x128xf32, #tpu.memory_space<vmem>>) attributes {dimension_semantics = [#tpu.dimension_semantics<parallel>, #tpu.dimension_semantics<parallel>], iteration_bounds = array<i64: 1, 1>, scalar_prefetch = 0 : i64, scratch_operands = 0 : i64, tpu.core_type = #tpu.core_type<tc>, window_params = [{transform_indices = @transform_0, window_bounds = array<i64: 2, 128>}, {transform_indices = @transform_1, window_bounds = array<i64: 128, 128>}, {transform_indices = @transform_2, window_bounds = array<i64: 1, 128>}, {transform_indices = @transform_3, window_bounds = array<i64: 2, 128>}]} {
    %c0 = arith.constant 0 : index
    %c0_0 = arith.constant 0 : index
    %0 = vector.load %arg2[%c0, %c0_0] : memref<2x128xf32, #tpu.memory_space<vmem>>, vector<2x128xf32>
    %c0_1 = arith.constant 0 : index
    %c0_2 = arith.constant 0 : index
    %1 = vector.load %arg3[%c0_1, %c0_2] : memref<128x128xf32, #tpu.memory_space<vmem>>, vector<128x128xf32>
    %cst = arith.constant dense<0.000000e+00> : vector<2x128xf32>
    %2 = tpu.matmul %0, %1, %cst {dimension_numbers = #tpu.dot_dimension_numbers<[1], [1], [0], [0], [0, 0, 1, 0], [], []>} : vector<2x128xf32>, vector<128x128xf32>, vector<2x128xf32> -> vector<2x128xf32>
    %c0_3 = arith.constant 0 : index
    %c0_4 = arith.constant 0 : index
    %3 = vector.load %arg4[%c0_3, %c0_4] : memref<1x128xf32, #tpu.memory_space<vmem>>, vector<1x128xf32>
    %4 = vector.broadcast %3 : vector<1x128xf32> to vector<2x128xf32>
    %5 = arith.addf %2, %4 : vector<2x128xf32>
    %6 = math.tanh %5 : vector<2x128xf32>
    %c0_5 = arith.constant 0 : index
    %c0_6 = arith.constant 0 : index
    %7 = vector.load %arg5[%c0_5, %c0_6] : memref<2x128xf32, #tpu.memory_space<vmem>>, vector<2x128xf32>
    tpu.vector_store %arg5[%c0_5, %c0_6], %6 {strides = array<i32>} : memref<2x128xf32, #tpu.memory_space<vmem>>, vector<2x128xf32>,
    return
  }
  func.func @transform_0(%arg0: i32, %arg1: i32) -> (i32, i32) {
    %c0_i32 = arith.constant 0 : i32
    %c0_i32_0 = arith.constant 0 : i32
    return %arg1, %c0_i32 : i32, i32
  }
  func.func @transform_1(%arg0: i32, %arg1: i32) -> (i32, i32) {
    %c0_i32 = arith.constant 0 : i32
    %c0_i32_0 = arith.constant 0 : i32
    return %arg0, %c0_i32 : i32, i32
  }
  func.func @transform_2(%arg0: i32, %arg1: i32) -> (i32, i32) {
    %c0_i32 = arith.constant 0 : i32
    %c0_i32_0 = arith.constant 0 : i32
    return %c0_i32, %arg0 : i32, i32
  }
  func.func @transform_3(%arg0: i32, %arg1: i32) -> (i32, i32) {
    %c0_i32 = arith.constant 0 : i32
    return %arg1, %arg0 : i32, i32
  }
}

</mosaic_0001>

<bundles_post_ra>
// kernel: bert_pooler.1
= control target key start
LH: loop header
LB: loop body
LE: loop exit
PB: predicated region body
PF: predicated region fallthrough
CT: control target
= control target key end

     0   :  { %v232_v2 = vmov 0.0|0.0   ;;  %vm233_vm0 = vmmov 0   ;;  %v234_v4 = vmov 0.0   ;;  %s322_s0 = inlined_call_operand.vmem [shape: f32[2,256], index: 0, kind: input, shape index: {}]   ;;  %s323_s1 = inlined_call_operand.vmem [shape: f32[128,128], index: 1, kind: input, shape index: {}]   ;;  %s324_s2 = inlined_call_operand.vmem [shape: f32[1,128], index: 2, kind: input, shape index: {}]   ;;  %s325_s3 = inlined_call_operand.hbm [shape: f32[2,128], index: 3, kind: output, shape index: {}]  }
   0x1   :  { %v16_v0 = vld [vmem:[%s323_s1] sm:$0xff]  ;;  %v17_v1 = vld [vmem:[%s323_s1 + $0x8] sm:$0xff]  ;;  %178 = vmatprep.subr.bf16.mxu0 %v232_v2  ;;  %175 = vmatprep.mubr.msk.f32.mxu0 %vm233_vm0, %v234_v4  ;;  %v18_v5 = vld [vmem:[%s323_s1 + $0x10] sm:$0xff] }
   0x2   :  { %v179_v3 = vpack.c.bf16 %v17_v1, %v16_v0  ;;  %v19_v6 = vld [vmem:[%s323_s1 + $0x18] sm:$0xff] }
   0x4   :  { %180 = vmatpush3.bf16.xpose.msra.mxu0 %v179_v3 }
   0x5   :  { %181 = vmatprep.subr.bf16.mxu0 %v232_v2 }
   0x6   :  { %8 = vsyncpa [#allocation3], 0  ;;  %v182_v7 = vpack.c.bf16 %v19_v6, %v18_v5  ;;  %v20_v8 = vld [vmem:[%s323_s1 + $0x20] sm:$0xff]  ;;  %v21_v9 = vld [vmem:[%s323_s1 + $0x28] sm:$0xff]  ;;  %s235_s21 = smov [#allocation2]  }
   0x7   :  { %v185_v10 = vpack.c.bf16 %v21_v9, %v20_v8  ;;  %v22_v11 = vld [vmem:[%s323_s1 + $0x30] sm:$0xff]  ;;  %v23_v12 = vld [vmem:[%s323_s1 + $0x38] sm:$0xff]  ;;  %v24_v14 = vld [vmem:[%s323_s1 + $0x40] sm:$0xff]  ;;  %s117_s22 = sshll.u32 %s235_s21, 4  ;;  %s118_s22 = int_to_ptr.vmem [resolvable:$true] %s117_s22 }
   0x8   :  { %v188_v13 = vpack.c.bf16 %v23_v12, %v22_v11  ;;  %v25_v15 = vld [vmem:[%s323_s1 + $0x48] sm:$0xff]  ;;  %v26_v17 = vld [vmem:[%s323_s1 + $0x50] sm:$0xff]  ;;  %v27_v18 = vld [vmem:[%s323_s1 + $0x58] sm:$0xff]  ;;  %p213_p1 = scmp.lt.s32.totalorder %s118_s22, %s118_s22 }
   0x9   :  { %v191_v16 = vpack.c.bf16 %v25_v15, %v24_v14  ;;  %v194_v19 = vpack.c.bf16 %v27_v18, %v26_v17  ;;  %v28_v20 = vld [vmem:[%s323_s1 + $0x60] sm:$0xff]  ;;  %v29_v21 = vld [vmem:[%s323_s1 + $0x68] sm:$0xff]  ;;  %v30_v23 = vld [vmem:[%s323_s1 + $0x70] sm:$0xff] }
   0xa   :  { %v197_v22 = vpack.c.bf16 %v29_v21, %v28_v20  ;;  %v31_v24 = vld [vmem:[%s323_s1 + $0x78] sm:$0xff]  ;;  %v15_v26 = vld [vmem:[%s322_s0] sm:$0x3]  ;;  %s208_s1 = scalar_lea.vmem %s118_s22, 32 }
   0xb   :  { %v200_v25 = vpack.c.bf16 %v31_v24, %v30_v23  ;;  %v125_v27 = vld [vmem:[%s324_s2] ss:$0 sm:$0xff]  ;;  %p209_p0 = scmp.ne.s32.totalorder %s118_s22, %s208_s1  ;;  %p214_p2 = scmp.lt.s32.totalorder %s208_s1, %s208_s1 }
   0xc   :  { %183 = vmatpush3.bf16.xpose.msra.mxu0 %v182_v7 }
   0xd   :  { %184 = vmatprep.subr.bf16.mxu0 %v232_v2  ;;  %p215_p3 = por %p214_p2, %p213_p1 }
   0xf   :  { %p216_p4 = pnand %p215_p3, %p209_p0 }
  0x14   :  { %186 = vmatpush3.bf16.xpose.msra.mxu0 %v185_v10 }
  0x15   :  { %187 = vmatprep.subr.bf16.mxu0 %v232_v2 }
  0x1c   :  { %189 = vmatpush3.bf16.xpose.msra.mxu0 %v188_v13 }
  0x1d   :  { %190 = vmatprep.subr.bf16.mxu0 %v232_v2 }
  0x24   :  { %192 = vmatpush3.bf16.xpose.msra.mxu0 %v191_v16 }
  0x25   :  { %193 = vmatprep.subr.bf16.mxu0 %v232_v2 }
  0x2c   :  { %195 = vmatpush3.bf16.xpose.msra.mxu0 %v194_v19 }
  0x2d   :  { %196 = vmatprep.subr.bf16.mxu0 %v232_v2 }
  0x34   :  { %198 = vmatpush3.bf16.xpose.msra.mxu0 %v197_v22 }
  0x35   :  { %199 = vmatprep.subr.bf16.mxu0 %v232_v2 }
  0x3c   :  { %201 = vmatpush3.bf16.xpose.msra.mxu0 %v200_v25 }
  0x43   :  { %176 = vmatmul.mubr.f32.vlgmr.msra.gmra.mrb[0].mxu0 %v15_v26 }
 0x116   :  { %v105_v28 = vpop.f32.mrb[0].mxu0 }
 0x117   :  { %v106_v29 = vadd.f32 %v125_v27, %v105_v28  ;;  %v177_v30 = vpop.f32.mrb[1].mxu0 }
 0x119   :  { %206 = vtanh.f32 %v106_v29 }
 0x123   :  { %v207_v31 = vpop.eup %206 }
 0x124   :  { %110 = vst [vmem:[#allocation2] sm:$0x3] %v207_v31 }
 0x125   :  { %219 = shalt.err (!%p216_p4)
}
 0x126   :  { %s220_s2 = scalar_lea.hbm %s325_s3, 32 }
 0x127   :  { %p221_p5 = scmp.ne.s32.totalorder %s325_s3, %s220_s2  ;;  %p224_p6 = scmp.lt.u32.totalorder %s220_s2, %s325_s3 }
 0x129   :  { %p226_p7 = pnand %p224_p6, %p221_p5 }
 0x12b   :  { %229 = shalt.err (!%p226_p7)
}
 0x12c   :  { %120 = dma.vmem_to_hbm [thread:$0]  %s118_s22, 32, %s325_s3, [#allocation3]  }
 0x12d   :  { %230 = dma.done.wait [#allocation3], 32  }
 0x12e   :  { %231 = vsyncadd [#allocation3], 4294967264 }
 0x12f   :  { %124 = vsyncpa [#allocation3], 1 }

</bundles_post_ra>
